<compile_context>
chip_gen: v5e
topology: v5e:2x2
jax: 0.10.0
libtpu: 0.0.40
codegen_flags: <defaults>
</compile_context>

<pallas_src>
import functools
import math

import jax
import jax.numpy as jnp
import numpy as np
from jax.experimental import pallas as pl
from jax.experimental.pallas import tpu as pltpu


def _round_up(x, m):
    return (x + m - 1) // m * m


def _conv3x3_kernel(xs_ref, w_ref, m_ref, o_ref, acc_ref, *, L_out):
    """One batch element of the 3x3 'same' convolution.

    xs_ref : (1, 3*Cin, Ls) bf16  H-padded input flattened over (H+2, W) lanes and
                                  stacked over the 3 kh row taps along channels
                                  (channel kh*Cin + c is channel c shifted by kh*W).
    w_ref  : (3, Cout, 3*Cin) bf16  per-kw weight slabs, K dim ordered (kh, c).
    m_ref  : (2, L_out) bf16  edge masks: row 0 zero where w == 0 (left halo),
                              row 1 zero where w == W-1 (right halo).
    o_ref  : (1, Cout, L_out)  output slab; column o = h*W + w (compact, no junk cols).
    acc_ref: (Cout, L_out) f32 VMEM accumulator scratch.
    """
    for kw in range(3):                                    # static unroll: 3 kw taps
        patch = xs_ref[0, :, pl.ds(kw, L_out)]             # (3*Cin, L_out) bf16
        if kw == 0:
            patch = patch * m_ref[pl.ds(0, 1), :]          # kill wrapped left-edge reads
        elif kw == 2:
            patch = patch * m_ref[pl.ds(1, 1), :]          # kill wrapped right-edge reads
        part = jnp.dot(w_ref[kw], patch,                   # (Cout, L_out), K = 3*Cin
                       preferred_element_type=jnp.float32)
        if kw == 0:
            acc_ref[...] = part
        else:
            acc_ref[...] += part
    o_ref[0] = acc_ref[...].astype(o_ref.dtype)


def overlap_patch_embed_fwd(x, weight, out_dtype=jnp.float32):
    """x: (B, Cin, H, W); weight: (Cout, Cin, 3, 3) -> (B, Cout, H, W). stride 1, pad 1, no bias."""
    B, Cin, H, W = x.shape
    Cout = weight.shape[0]

    L_out = _round_up(H * W, 128)           # lane-dense output width (== H*W for 32x32)
    Ls = _round_up(L_out + 2, 128)          # stacked-input lane width (covers kw shifts 0..2)

    # Zero-pad along H only (width halo handled in-kernel by the edge masks), flatten
    # (H+2, W) into lanes, front-pad by 1 so the (kh=0, kw=0) tap offset is >= 0, then
    # stack the 3 kh-shifted copies along channels so each kw tap is one K=3*Cin matmul.
    Lflat = (H + 2) * W
    Lpad = max(1 + Lflat, 2 * W + Ls)
    xp = jnp.pad(x.astype(jnp.bfloat16), ((0, 0), (0, 0), (1, 1), (0, 0)))
    xf = jnp.pad(xp.reshape(B, Cin, Lflat), ((0, 0), (0, 0), (1, Lpad - 1 - Lflat)))
    xs = jnp.concatenate([xf[:, :, kh * W: kh * W + Ls] for kh in range(3)], axis=1)

    # (Cout, Cin, kh, kw) -> (kw, Cout, kh*Cin): one (Cout, 3*Cin) weight slab per kw tap.
    wt = jnp.transpose(weight, (3, 0, 2, 1)).reshape(3, Cout, 3 * Cin).astype(jnp.bfloat16)

    # Constant edge masks (built at trace time with numpy -> folded into the jit):
    # row 0 zeroes output columns with w == 0 (left tap wraps to the previous row),
    # row 1 zeroes w == W-1 (right tap wraps to the next row).
    col = np.arange(L_out) % W
    mask = np.ones((2, L_out), np.float32)
    mask[0, col == 0] = 0.0
    mask[1, col == W - 1] = 0.0
    edge_mask = jnp.asarray(mask, dtype=jnp.bfloat16)

    kernel = functools.partial(_conv3x3_kernel, L_out=L_out)
    flops = 2 * B * Cout * (9 * Cin) * (H * W)
    bytes_accessed = (xs.size + wt.size + edge_mask.size) * 2 \
        + B * Cout * L_out * np.dtype(out_dtype).itemsize

    out = pl.pallas_call(
        kernel,
        # NOTE: for B == 1 add a 2-way Cout split to keep both v7x TensorCores busy.
        grid=(B,),
        in_specs=[
            pl.BlockSpec((1, 3 * Cin, Ls), lambda b: (b, 0, 0)),
            pl.BlockSpec((3, Cout, 3 * Cin), lambda b: (0, 0, 0)),   # resident across steps
            pl.BlockSpec((2, L_out), lambda b: (0, 0)),              # resident across steps
        ],
        out_specs=pl.BlockSpec((1, Cout, L_out), lambda b: (b, 0, 0)),
        out_shape=jax.ShapeDtypeStruct((B, Cout, L_out), out_dtype),
        scratch_shapes=[pltpu.VMEM((Cout, L_out), jnp.float32)],
        compiler_params=pltpu.CompilerParams(
            dimension_semantics=("parallel",)),
        cost_estimate=pl.CostEstimate(
            flops=flops, transcendentals=0, bytes_accessed=bytes_accessed),
    )(xs, wt, edge_mask)

    # Compact layout: column o = h*W + w, so this is a no-op slice (H*W already a
    # multiple of 128 here) plus a layout-preserving reshape — no extra HBM crop pass.
    return out[:, :, :H * W].reshape(B, Cout, H, W)


if __name__ == "__main__":
    key = jax.random.PRNGKey(0)
    kx, kw = jax.random.split(key)
    B, Cin, H, W = 2, 3, 32, 32
    Cout = 48                                     # embed_dim

    x = jax.random.normal(kx, (B, Cin, H, W), dtype=jnp.float32)
    # Deterministic synthetic Conv2d weight (fan-in scaled); bias=False per module default.
    weight = jax.random.normal(kw, (Cout, Cin, 3, 3), dtype=jnp.float32) / math.sqrt(Cin * 9)

    y = jax.jit(overlap_patch_embed_fwd)(x, weight)
    y = jax.block_until_ready(y)

    assert y.shape == (B, Cout, H, W), y.shape
    assert y.dtype == jnp.float32
    assert bool(jnp.all(jnp.isfinite(y)))

    # Reference check against the XLA f32 conv (tolerance covers bf16 MXU operands).
    ref = jax.lax.conv_general_dilated(
        x, weight, window_strides=(1, 1), padding=((1, 1), (1, 1)),
        dimension_numbers=("NCHW", "OIHW", "NCHW"))
    err = float(jnp.max(jnp.abs(y - ref)))
    assert err < 1e-1, err

    print("KERNEL_OK")
</pallas_src>

<mosaic_0001>
module attributes {stable_mosaic.version = 11 : i64} {
  func.func @_conv3x3_kernel(%arg0: i32, %arg1: memref<1x9x1152xbf16, #tpu.memory_space<vmem>>, %arg2: memref<3x48x9xbf16, #tpu.memory_space<vmem>>, %arg3: memref<2x1024xbf16, #tpu.memory_space<vmem>>, %arg4: memref<1x48x1024xf32, #tpu.memory_space<vmem>>, %arg5: memref<48x1024xf32, #tpu.memory_space<vmem>>) attributes {dimension_semantics = [#tpu.dimension_semantics<parallel>], iteration_bounds = array<i64: 2>, scalar_prefetch = 0 : i64, scratch_operands = 1 : i64, tpu.core_type = #tpu.core_type<tc>, window_params = [{transform_indices = @transform_0, window_bounds = array<i64: 1, 9, 1152>}, {pipeline_mode = #tpu.pipeline_mode<synchronous>, transform_indices = @transform_1, window_bounds = array<i64: 3, 48, 9>}, {pipeline_mode = #tpu.pipeline_mode<synchronous>, transform_indices = @transform_2, window_bounds = array<i64: 2, 1024>}, {transform_indices = @transform_3, window_bounds = array<i64: 1, 48, 1024>}]} {
    %c0 = arith.constant 0 : index
    %c0_0 = arith.constant 0 : index
    %c0_1 = arith.constant 0 : index
    %0 = vector.load %arg1[%c0, %c0_0, %c0_1] : memref<1x9x1152xbf16, #tpu.memory_space<vmem>>, vector<1x9x1024xbf16>
    %1 = vector.shape_cast %0 : vector<1x9x1024xbf16> to vector<9x1024xbf16>
    %c0_2 = arith.constant 0 : index
    %c0_3 = arith.constant 0 : index
    %2 = vector.load %arg3[%c0_2, %c0_3] : memref<2x1024xbf16, #tpu.memory_space<vmem>>, vector<1x1024xbf16>
    %3 = vector.broadcast %2 : vector<1x1024xbf16> to vector<9x1024xbf16>
    %4 = arith.mulf %1, %3 : vector<9x1024xbf16>
    %c0_4 = arith.constant 0 : index
    %c0_5 = arith.constant 0 : index
    %c0_6 = arith.constant 0 : index
    %5 = vector.load %arg2[%c0_4, %c0_5, %c0_6] : memref<3x48x9xbf16, #tpu.memory_space<vmem>>, vector<1x48x9xbf16>
    %6 = vector.shape_cast %5 : vector<1x48x9xbf16> to vector<48x9xbf16>
    %cst = arith.constant dense<0.000000e+00> : vector<48x1024xf32>
    %7 = tpu.matmul %6, %4, %cst {dimension_numbers = #tpu.dot_dimension_numbers<[1], [0], [0], [1], [0, 0, 1, 1], [], []>} : vector<48x9xbf16>, vector<9x1024xbf16>, vector<48x1024xf32> -> vector<48x1024xf32>
    %c0_7 = arith.constant 0 : index
    %c0_8 = arith.constant 0 : index
    %8 = vector.load %arg5[%c0_7, %c0_8] : memref<48x1024xf32, #tpu.memory_space<vmem>>, vector<48x1024xf32>
    tpu.vector_store %arg5[%c0_7, %c0_8], %7 {strides = array<i32>} : memref<48x1024xf32, #tpu.memory_space<vmem>>, vector<48x1024xf32>,
    %c0_9 = arith.constant 0 : index
    %c0_10 = arith.constant 0 : index
    %c1 = arith.constant 1 : index
    %9 = vector.load %arg1[%c0_9, %c0_10, %c1] : memref<1x9x1152xbf16, #tpu.memory_space<vmem>>, vector<1x9x1024xbf16>
    %10 = vector.shape_cast %9 : vector<1x9x1024xbf16> to vector<9x1024xbf16>
    %c1_11 = arith.constant 1 : index
    %c0_12 = arith.constant 0 : index
    %c0_13 = arith.constant 0 : index
    %11 = vector.load %arg2[%c1_11, %c0_12, %c0_13] : memref<3x48x9xbf16, #tpu.memory_space<vmem>>, vector<1x48x9xbf16>
    %12 = vector.shape_cast %11 : vector<1x48x9xbf16> to vector<48x9xbf16>
    %cst_14 = arith.constant dense<0.000000e+00> : vector<48x1024xf32>
    %13 = tpu.matmul %12, %10, %cst_14 {dimension_numbers = #tpu.dot_dimension_numbers<[1], [0], [0], [1], [0, 0, 1, 1], [], []>} : vector<48x9xbf16>, vector<9x1024xbf16>, vector<48x1024xf32> -> vector<48x1024xf32>
    %c0_15 = arith.constant 0 : index
    %c0_16 = arith.constant 0 : index
    %14 = vector.load %arg5[%c0_15, %c0_16] : memref<48x1024xf32, #tpu.memory_space<vmem>>, vector<48x1024xf32>
    %15 = arith.addf %14, %13 : vector<48x1024xf32>
    %c0_17 = arith.constant 0 : index
    %c0_18 = arith.constant 0 : index
    %16 = vector.load %arg5[%c0_17, %c0_18] : memref<48x1024xf32, #tpu.memory_space<vmem>>, vector<48x1024xf32>
    tpu.vector_store %arg5[%c0_17, %c0_18], %15 {strides = array<i32>} : memref<48x1024xf32, #tpu.memory_space<vmem>>, vector<48x1024xf32>,
    %c0_19 = arith.constant 0 : index
    %c0_20 = arith.constant 0 : index
    %c2 = arith.constant 2 : index
    %17 = vector.load %arg1[%c0_19, %c0_20, %c2] : memref<1x9x1152xbf16, #tpu.memory_space<vmem>>, vector<1x9x1024xbf16>
    %18 = vector.shape_cast %17 : vector<1x9x1024xbf16> to vector<9x1024xbf16>
    %c1_21 = arith.constant 1 : index
    %c0_22 = arith.constant 0 : index
    %19 = vector.load %arg3[%c1_21, %c0_22] : memref<2x1024xbf16, #tpu.memory_space<vmem>>, vector<1x1024xbf16>
    %20 = vector.broadcast %19 : vector<1x1024xbf16> to vector<9x1024xbf16>
    %21 = arith.mulf %18, %20 : vector<9x1024xbf16>
    %c2_23 = arith.constant 2 : index
    %c0_24 = arith.constant 0 : index
    %c0_25 = arith.constant 0 : index
    %22 = vector.load %arg2[%c2_23, %c0_24, %c0_25] : memref<3x48x9xbf16, #tpu.memory_space<vmem>>, vector<1x48x9xbf16>
    %23 = vector.shape_cast %22 : vector<1x48x9xbf16> to vector<48x9xbf16>
    %cst_26 = arith.constant dense<0.000000e+00> : vector<48x1024xf32>
    %24 = tpu.matmul %23, %21, %cst_26 {dimension_numbers = #tpu.dot_dimension_numbers<[1], [0], [0], [1], [0, 0, 1, 1], [], []>} : vector<48x9xbf16>, vector<9x1024xbf16>, vector<48x1024xf32> -> vector<48x1024xf32>
    %c0_27 = arith.constant 0 : index
    %c0_28 = arith.constant 0 : index
    %25 = vector.load %arg5[%c0_27, %c0_28] : memref<48x1024xf32, #tpu.memory_space<vmem>>, vector<48x1024xf32>
    %26 = arith.addf %25, %24 : vector<48x1024xf32>
    %c0_29 = arith.constant 0 : index
    %c0_30 = arith.constant 0 : index
    %27 = vector.load %arg5[%c0_29, %c0_30] : memref<48x1024xf32, #tpu.memory_space<vmem>>, vector<48x1024xf32>
    tpu.vector_store %arg5[%c0_29, %c0_30], %26 {strides = array<i32>} : memref<48x1024xf32, #tpu.memory_space<vmem>>, vector<48x1024xf32>,
    %c0_31 = arith.constant 0 : index
    %c0_32 = arith.constant 0 : index
    %28 = vector.load %arg5[%c0_31, %c0_32] : memref<48x1024xf32, #tpu.memory_space<vmem>>, vector<48x1024xf32>
    %c0_33 = arith.constant 0 : index
    %c0_34 = arith.constant 0 : index
    %c0_35 = arith.constant 0 : index
    %29 = vector.load %arg4[%c0_33, %c0_34, %c0_35] : memref<1x48x1024xf32, #tpu.memory_space<vmem>>, vector<1x48x1024xf32>
    %30 = vector.shape_cast %29 : vector<1x48x1024xf32> to vector<48x1024xf32>
    %31 = vector.shape_cast %28 : vector<48x1024xf32> to vector<1x48x1024xf32>
    tpu.vector_store %arg4[%c0_33, %c0_34, %c0_35], %31 {strides = array<i32>} : memref<1x48x1024xf32, #tpu.memory_space<vmem>>, vector<1x48x1024xf32>,
    return
  }
  func.func @transform_0(%arg0: i32) -> (i32, i32, i32) {
    %c0_i32 = arith.constant 0 : i32
    %c0_i32_0 = arith.constant 0 : i32
    %c0_i32_1 = arith.constant 0 : i32
    return %arg0, %c0_i32, %c0_i32_0 : i32, i32, i32
  }
  func.func @transform_1(%arg0: i32) -> (i32, i32, i32) {
    %c0_i32 = arith.constant 0 : i32
    %c0_i32_0 = arith.constant 0 : i32
    %c0_i32_1 = arith.constant 0 : i32
    %c0_i32_2 = arith.constant 0 : i32
    return %c0_i32, %c0_i32_0, %c0_i32_1 : i32, i32, i32
  }
  func.func @transform_2(%arg0: i32) -> (i32, i32) {
    %c0_i32 = arith.constant 0 : i32
    %c0_i32_0 = arith.constant 0 : i32
    %c0_i32_1 = arith.constant 0 : i32
    return %c0_i32, %c0_i32_0 : i32, i32
  }
  func.func @transform_3(%arg0: i32) -> (i32, i32, i32) {
    %c0_i32 = arith.constant 0 : i32
    %c0_i32_0 = arith.constant 0 : i32
    %c0_i32_1 = arith.constant 0 : i32
    return %arg0, %c0_i32, %c0_i32_0 : i32, i32, i32
  }
}

</mosaic_0001>

<bundles_post_ra>
// kernel: overlap_patch_embed_fwd.1
= control target key start
LH: loop header
LB: loop body
LE: loop exit
PB: predicated region body
PF: predicated region fallthrough
CT: control target
= control target key end

     0   :  { %s1996_s12 = smov 0   ;;  %s2755_s0 = inlined_call_operand.vmem [shape: bf16[2,9,1152], index: 0, kind: input, shape index: {}]   ;;  %s2756_s1 = inlined_call_operand.vmem [shape: bf16[3,48,9], index: 1, kind: input, shape index: {}]   ;;  %s2757_s2 = inlined_call_operand.vmem [shape: bf16[2,1024], index: 2, kind: input, shape index: {}]   ;;  %s2758_s3 = inlined_call_operand.vmem [shape: f32[2,48,1024], index: 3, kind: output, shape index: {}]  }
   0x1 LB: > { %s1752_s13 = sadd.s32 4294967295, %s1970_s12   ;;  %p1756_p0 = scmp.ge.s32.totalorder %s1970_s12, 1  ;;  %s1970_s12 = sphi %s1996_s12, %s13_s12  }
   0x2   : > { %p137_p1 = scmp.lt.s32.totalorder %s1970_s12, 3 }
   0x4   : > { %p138_p2 = pnand %p1756_p0, %p137_p1 }
   0x6   : > { %141 = sbr.rel (%p138_p2) target bundleno = 590 (0x24e), region = 32 }
   0xb   : > { %p161_p3 = scmp.lt.s32.totalorder %s1752_s13, 1  ;;  %v180_v0 = vld [vmem:[%s2757_s2] sm:$0xff]  ;;  %s1972_s20 = smov 127   ;;  %vm294_vm0 = vcmask 1043456   ;;  %vm295_vm1 = vcmask 1044480   ;;  %v1973_v37 = vmov 65535  }
   0xc   : > { %182 = vst [vmem:[#allocation1] ss:$9 sm:$0xff] %v180_v0  ;;  %v296_v38 = vsel %vm294_vm0, 4294967295, %v1973_v37  ;;  %vm284_vm2 = vcmask 72704   ;;  %s1974_s23 = smov 2   ;;  %vm1130_vm3 = vcmask 15360  }
   0xd   : > { %s2852_s13 = smov (!%p161_p3, %s1752_s13), 1  ;;  %v2071_v59 = vsel %vm295_vm1, %v296_v38, 0  ;;  %vm649_vm4 = vcmask 1039360   ;;  %s1975_s30 = smov 126   ;;  %vm1223_vm5 = vcmask 1031168  }
   0xe   : > { %s1935_s16 = smul.u32 72, %s2852_s13 }
  0x10   : > { %s2013_s19 = scalar_lea.vmem %s2755_s0, %s1935_s16  ;;  %s1936_s16 = smul.u32 384, %s2852_s13 }
  0x11   : > { %v1831_v1 = vld [vmem:[%s2013_s19 + $0x10] sm:$0xf]  ;;  %v1926_v2 = vld [vmem:[%s2013_s19 + $0x30] sm:$0x10]  ;;  %v1823_v3 = vld [vmem:[%s2013_s19 + $0x8] sm:$0xf] }
  0x12   : > { %v1832_v4 = vor.u32 %v1926_v2, %v1831_v1  ;;  %v1925_v5 = vld [vmem:[%s2013_s19 + $0x28] sm:$0x10]  ;;  %v1920_v6 = vld [vmem:[%s2013_s19 + $0x4] sm:$0xf]  ;;  %v1817_v7 = vld [vmem:[%s2013_s19 + $0x24] sm:$0x10] }
  0x13   : > { %v1824_v8 = vor.u32 %v1925_v5, %v1823_v3  ;;  %v1820_v9 = vor.u32 %v1920_v6, %v1817_v7  ;;  %v1921_v10 = vld [vmem:[%s2013_s19 + $0xc] sm:$0xf]  ;;  %v1825_v11 = vld [vmem:[%s2013_s19 + $0x2c] sm:$0x10]  ;;  %v1815_v12 = vld [vmem:[%s2013_s19] sm:$0xf] }
  0x14   : > { %639 = vrot.lane.b32.xlu1 %v1832_v4, %s1972_s20  ;;  %v1924_v13 = vld [vmem:[%s2013_s19 + $0x20] sm:$0x10]  ;;  %v1839_v15 = vld [vmem:[%s2013_s19 + $0x18] sm:$0xf]  ;;  %v1927_v16 = vld [vmem:[%s2013_s19 + $0x38] sm:$0x10]  ;;  %v1828_v31 = vor.u32 %v1921_v10, %v1825_v11 }
  0x15   : > { %635 = vrot.lane.b32.xlu0 %v1824_v8, %s1972_s20  ;;  %633 = vrot.lane.b32.xlu2 %v1820_v9, %s1972_s20  ;;  %v183_v14 = vld [vmem:[#allocation1] sm:$0xff]  ;;  %v184_v17 = vld [vmem:[#allocation1 + $0x9] sm:$0xff]  ;;  %v185_v19 = vld [vmem:[#allocation1 + $0x12] sm:$0xff]  ;;  %v1816_v23 = vor.u32 %v1924_v13, %v1815_v12  ;;  %v1840_v32 = vor.u32 %v1927_v16, %v1839_v15 }
  0x16   : > { %v191_v18 = vpack.i.b16 %v183_v14, %v183_v14  ;;  %v186_v20 = vld [vmem:[#allocation1 + $0x1b] sm:$0xff]  ;;  %v2030_v21 = vld [vmem:[#allocation1 + $0x24] sm:$0xff]  ;;  %v194_v22 = vpack.i.b16 %v184_v17, %v184_v17  ;;  %v2038_v26 = vld [vmem:[#allocation1 + $0x2d] sm:$0xff]  ;;  %v197_v30 = vpack.i.b16 %v185_v19, %v185_v19 }
  0x17   : > { %v2033_v24 = vld [vmem:[%s2013_s19 + $0x1c] sm:$0xf]  ;;  %v2036_v25 = vld [vmem:[%s2013_s19 + $0x3c] sm:$0x10]  ;;  %v176_v35 = vld [vmem:[%s2013_s19 + $0x24] sm:$0x11]  ;;  %v200_v40 = vpack.i.b16 %v186_v20, %v186_v20 }
  0x18   : > { %v2040_v27 = vld [vmem:[#allocation1 + $0x36] sm:$0xff]  ;;  %v2042_v28 = vld [vmem:[#allocation1 + $0x3f] sm:$0xff]  ;;  %v193_v29 = vperm.slane %v191_v18, 0  ;;  %v196_v36 = vperm.slane %v194_v22, 0  ;;  %v224_v43 = vunpack.c.h.bf16 %v176_v35  ;;  %v223_v45 = vunpack.c.l.bf16 %v176_v35  ;;  %v2054_v46 = vld [vmem:[%s2013_s19 + $0x8] sm:$0xff] }
  0x19   : > { %v1847_v33 = vld [vmem:[%s2013_s19 + $0x20] sm:$0xf]  ;;  %1039 = vst [vmem:[#allocation1] ss:$9 sm:$0xff] %v180_v0  ;;  %v1928_v41 = vld [vmem:[%s2013_s19 + $0x40] sm:$0x10]  ;;  %v217_v50 = vunpack.c.l.bf16 %v2054_v46  ;;  %v1844_v52 = vor.u32 %v2033_v24, %v2036_v25  ;;  %v218_v4 = vunpack.c.h.bf16 %v2054_v46 }
  0x1a   : > { %v2046_v34 = vld [vmem:[%s2013_s19] sm:$0xff]  ;;  %v231_v39 = vunpack.c.l.bf16 %v193_v29  ;;  %v2057_v47 = vld [vmem:[%s2013_s19 + $0x2c] sm:$0x11]  ;;  %v232_v48 = vunpack.c.l.bf16 %v196_v36  ;;  %v199_v49 = vperm.slane %v197_v30, 0  ;;  %v1848_v55 = vor.u32 %v1928_v41, %v1847_v33  ;;  %v1833_v35 = vld [vmem:[%s2013_s19 + $0x34] sm:$0x10] }
  0x1b   : > { %v216_v42 = vunpack.c.h.bf16 %v2046_v34  ;;  %v215_v44 = vunpack.c.l.bf16 %v2046_v34  ;;  %v225_v51 = vunpack.c.l.bf16 %v2057_v47  ;;  %v202_v61 = vperm.slane %v200_v40, 0  ;;  %v2083_v25 = vld [vmem:[%s2756_s1] sm:$0xff] }
  0x1c   : > { %631 = vrot.lane.b32.xlu1 %v1816_v23, %s1972_s20  ;;  %v247_v54 = vmul.f32 %v231_v39, %v223_v45  ;;  %v248_v57 = vmul.f32 %v232_v48, %v224_v43  ;;  %v233_v58 = vunpack.c.l.bf16 %v199_v49  ;;  %v1922_v23 = vld [vmem:[%s2013_s19 + $0x14] sm:$0xf]  ;;  %v226_v29 = vunpack.c.h.bf16 %v2057_v47 }
  0x1d   : > { %637 = vrot.lane.b32.xlu0 %v1828_v31, %s1972_s20  ;;  %643 = vrot.lane.b32.xlu2 %v1840_v32, %s1972_s20  ;;  %v239_v53 = vmul.f32 %v231_v39, %v215_v44  ;;  %v240_v56 = vmul.f32 %v232_v48, %v216_v42  ;;  %v234_v30 = vunpack.c.l.bf16 %v202_v61  ;;  %v1836_v47 = vor.u32 %v1922_v23, %v1833_v35 }
  0x1e   : > { %v241_v2 = vmul.f32 %v233_v58, %v217_v50  ;;  %v249_v3 = vmul.f32 %v233_v58, %v225_v51 }
  0x1f   : > { %v255_v60 = vpack.c.bf16 %v247_v54, %v239_v53  ;;  %v256_v1 = vpack.c.bf16 %v248_v57, %v240_v56  ;;  %v242_v53 = vmul.f32 %v234_v30, %v218_v4  ;;  %v250_v54 = vmul.f32 %v234_v30, %v226_v29 }
  0x20   : > { %v1041_v62 = vld [vmem:[#allocation1 + $0x9] sm:$0xff]  ;;  %v1042_v63 = vld [vmem:[#allocation1 + $0x12] sm:$0xff]  ;;  %v1043_v0 = vld [vmem:[#allocation1 + $0x1b] sm:$0xff]  ;;  %v257_v38 = vpack.c.bf16 %v249_v3, %v241_v2  ;;  %v209_v2 = vpack.i.b16 %v2040_v27, %v2040_v27  ;;  %v212_v3 = vpack.i.b16 %v2042_v28, %v2042_v28 }
  0x21   : > { %v1052_v5 = vshrl.u32 %v1041_v62, 16  ;;  %v1056_v6 = vshrl.u32 %v1042_v63, 16  ;;  %v1044_v7 = vld [vmem:[#allocation1 + $0x24] sm:$0xff]  ;;  %v1060_v8 = vshrl.u32 %v1043_v0, 16  ;;  %v1045_v10 = vld [vmem:[#allocation1 + $0x2d] sm:$0xff]  ;;  %v299_v11 = vand.u32 %v2071_v59, %v255_v60  ;;  %v1046_v14 = vld [vmem:[#allocation1 + $0x36] sm:$0xff] }
  0x22   : > { %v1040_v9 = vld [vmem:[#allocation1] sm:$0xff]  ;;  %v1064_v12 = vshrl.u32 %v1044_v7, 16  ;;  %v1068_v15 = vshrl.u32 %v1045_v10, 16  ;;  %v302_v16 = vand.u32 %v2071_v59, %v256_v1  ;;  %v1072_v20 = vshrl.u32 %v1046_v14, 16  ;;  %v2107_v0 = vld [vmem:[%s2756_s1 + $0x8] sm:$0xff]  ;;  %v2121_v1 = vld [vmem:[%s2756_s1 + $0x10] sm:$0xff] }
  0x23   : > { %v1048_v13 = vshrl.u32 %v1040_v9, 16  ;;  %v1053_v17 = vpack.i.b16 %v1052_v5, %v1052_v5  ;;  %v1057_v18 = vpack.i.b16 %v1056_v6, %v1056_v6  ;;  %v1061_v19 = vpack.i.b16 %v1060_v8, %v1060_v8  ;;  %329 = vmatpush.bf16.msra.mxu0 %v299_v11  ;;  %v2134_v5 = vld [vmem:[%s2013_s19 + $0x10] sm:$0xff] }
  0x24   : > { %647 = vrot.lane.b32.xlu1 %v1848_v55, %s1972_s20  ;;  %v1065_v22 = vpack.i.b16 %v1064_v12, %v1064_v12  ;;  %v1069_v24 = vpack.i.b16 %v1068_v15, %v1068_v15  ;;  %353 = vmatpush.bf16.msra.mxu1 %v302_v16  ;;  %v1073_v36 = vpack.i.b16 %v1072_v20, %v1072_v20  ;;  %v178_v6 = vld [vmem:[%s2013_s19 + $0x34] sm:$0x11]  ;;  %v211_v8 = vperm.slane %v209_v2, 0 }
  0x25   : > { %645 = vrot.lane.b32.xlu0 %v1844_v52, %s1972_s20  ;;  %v1055_v31 = vperm.slane %v1053_v17, 0  ;;  %v1059_v32 = vperm.slane %v1057_v18, 0  ;;  %v1063_v33 = vperm.slane %v1061_v19, 0  ;;  %v1049_v43 = vpack.i.b16 %v1048_v13, %v1048_v13  ;;  %v2141_v12 = vld [vmem:[%s2013_s19 + $0x18] sm:$0xff] }
  0x26   : > { %v1067_v37 = vperm.slane %v1065_v22, 0  ;;  %1771 = vmatmul.msk.bf16.vlgmr.msra.gmra.mxu0 %vm284_vm2, %v2083_v25  ;;  %v1071_v48 = vperm.slane %v1069_v24, 0  ;;  %v305_v49 = vand.u32 %v2071_v59, %v257_v38  ;;  %v1075_v52 = vperm.slane %v1073_v36, 0  ;;  %v179_v13 = vld [vmem:[%s2013_s19 + $0x3c] sm:$0x11] }
  0x27   : > { %v1099_v39 = vunpack.c.l.bf16 %v1055_v31  ;;  %v1100_v40 = vunpack.c.l.bf16 %v1059_v32  ;;  %v1101_v41 = vunpack.c.l.bf16 %v1063_v33  ;;  %1774 = vmatmul.msk.bf16.vlgmr.msra.gmra.mxu1 %vm284_vm2, %v2083_v25  ;;  %v1051_v56 = vperm.slane %v1049_v43, 0  ;;  %v2209_v2 = vld [vmem:[%s2756_s1 + $0x18] sm:$0xff] }
  0x28   : > { %v1102_v45 = vunpack.c.l.bf16 %v1067_v37  ;;  %377 = vmatpush.bf16.msra.mxu2 %v305_v49  ;;  %v258_v57 = vpack.c.bf16 %v250_v54, %v242_v53  ;;  %v1103_v58 = vunpack.c.l.bf16 %v1071_v48  ;;  %v1104_v60 = vunpack.c.l.bf16 %v1075_v52 }
  0x29   : > { %v1949_v51 = vpack.i.bf16 %v1100_v40, %v1099_v39  ;;  %v1098_v62 = vunpack.c.l.bf16 %v1051_v56  ;;  %v206_v7 = vpack.i.b16 %v2038_v26, %v2038_v26  ;;  %v214_v9 = vperm.slane %v212_v3, 0 }
  0x2a   : > { %v1954_v55 = vpack.i.bf16 %v1102_v45, %v1101_v41  ;;  %v308_v61 = vand.u32 %v2071_v59, %v258_v57  ;;  %v1959_v63 = vpack.i.bf16 %v1104_v60, %v1103_v58  ;;  %v220_v10 = vunpack.c.h.bf16 %v2134_v5  ;;  %v2200_v60 = vld [vmem:[%s2013_s19 + $0x24] sm:$0x11] }
  0x2b   : > { %1950 = vrot.lane.b32.xlu2 %v1949_v51, %s1974_s23  ;;  %1777 = vmatmul.msk.bf16.vlgmr.msra.gmra.mxu2 %vm284_vm2, %v2083_v25  ;;  %v228_v11 = vunpack.c.h.bf16 %v178_v6  ;;  %v208_v14 = vperm.slane %v206_v7, 0  ;;  %v221_v27 = vunpack.c.l.bf16 %v2141_v12  ;;  %v229_v15 = vunpack.c.l.bf16 %v179_v13 }
  0x2c   : > { %641 = vrot.lane.b32.xlu1 %v1836_v47, %s1972_s20  ;;  %401 = vmatpush.bf16.msra.mxu3 %v308_v61  ;;  %v237_v16 = vunpack.c.l.bf16 %v211_v8  ;;  %v2759_v28 = vunpack.c.h.bf16 %v2141_v12  ;;  %v230_v17 = vunpack.c.h.bf16 %v179_v13  ;;  %v238_v26 = vunpack.c.l.bf16 %v214_v9 }
  0x2d   : > { %1955 = vrot.lane.b32.xlu0 %v1954_v55, %s1974_s23  ;;  %v236_v18 = vunpack.c.l.bf16 %v208_v14  ;;  %v203_v19 = vpack.i.b16 %v2030_v21, %v2030_v21  ;;  %v219_v36 = vunpack.c.l.bf16 %v2134_v5  ;;  %v227_v37 = vunpack.c.l.bf16 %v178_v6 }
  0x2e   : > { %v245_v20 = vmul.f32 %v237_v16, %v221_v27  ;;  %v253_v22 = vmul.f32 %v237_v16, %v229_v15  ;;  %v246_v23 = vmul.f32 %v238_v26, %v2759_v28  ;;  %v254_v24 = vmul.f32 %v238_v26, %v230_v17  ;;  %v1036_v28 = vld [vmem:[%s2013_s19 + $0x44] sm:$0x1] }
  0x2f   : > { %1780 = vmatmul.msk.bf16.vlgmr.msra.gmra.mxu3 %vm284_vm2, %v2083_v25  ;;  %v244_v29 = vmul.f32 %v236_v18, %v220_v10  ;;  %v252_v30 = vmul.f32 %v236_v18, %v228_v11  ;;  %v205_v31 = vperm.slane %v203_v19, 0 }
  0x30   : > { %v261_v32 = vpack.c.bf16 %v253_v22, %v245_v20  ;;  %v262_v33 = vpack.c.bf16 %v254_v24, %v246_v23  ;;  %v1047_v24 = vld [vmem:[#allocation1 + $0x3f] sm:$0xff] }
  0x31   : > { %v260_v35 = vpack.c.bf16 %v252_v30, %v244_v29  ;;  %v235_v21 = vunpack.c.l.bf16 %v205_v31  ;;  %v2236_v29 = vld [vmem:[%s2013_s19 + $0x34] sm:$0x11]  ;;  %v2241_v30 = vld [vmem:[%s2756_s1 + $0x20] sm:$0xff] }
  0x32   : > { %v317_v38 = vand.u32 %v2071_v59, %v261_v32  ;;  %v320_v39 = vand.u32 %v2071_v59, %v262_v33  ;;  %v1076_v32 = vshrl.u32 %v1047_v24, 16 }
  0x33   : > { %1114 = vrot.lane.b32.xlu2 %v1098_v62, %s1974_s23  ;;  %v314_v40 = vand.u32 %v2071_v59, %v260_v35  ;;  %v243_v41 = vmul.f32 %v235_v21, %v219_v36  ;;  %v251_v43 = vmul.f32 %v235_v21, %v227_v37  ;;  %v1093_v21 = vunpack.c.l.bf16 %v2236_v29 }
  0x34   : > { %473 = vmatpush.bf16.msrb.mxu2 %v317_v38  ;;  %497 = vmatpush.bf16.msrb.mxu3 %v320_v39 }
  0x35   : > { %1960 = vrot.lane.b32.xlu0 %v1959_v63, %s1974_s23  ;;  %449 = vmatpush.bf16.msrb.mxu1 %v314_v40  ;;  %v259_v45 = vpack.c.bf16 %v251_v43, %v243_v41 }
  0x36   : > { %1772 = vmatmul.msk.bf16.gmra.mxu0 %vm284_vm2, %v2107_v0 }
  0x37   : > { %1775 = vmatmul.msk.bf16.gmra.mxu1 %vm284_vm2, %v2107_v0  ;;  %v311_v47 = vand.u32 %v2071_v59, %v259_v45  ;;  %v1089_v45 = vunpack.c.l.bf16 %v2200_v60 }
  0x39   : > { %425 = vmatpush.bf16.msrb.mxu0 %v311_v47 }
  0x3b   : > { %1778 = vmatmul.msk.bf16.gmra.mxu2 %vm284_vm2, %v2107_v0 }
  0x3f   : > { %1781 = vmatmul.msk.bf16.gmra.mxu3 %vm284_vm2, %v2107_v0 }
  0x46   : > { %1773 = vmatmul.msk.bf16.gmra.mxu0 %vm284_vm2, %v2121_v1 }
  0x47   : > { %1776 = vmatmul.msk.bf16.gmra.mxu1 %vm284_vm2, %v2121_v1 }
  0x4b   : > { %1779 = vmatmul.msk.bf16.gmra.mxu2 %vm284_vm2, %v2121_v1 }
  0x4f   : > { %1782 = vmatmul.msk.bf16.gmra.mxu3 %vm284_vm2, %v2121_v1 }
  0x56   : > { %1783 = vmatmul.msk.bf16.vlgmr.msrb.gmra.mxu0 %vm284_vm2, %v2083_v25 }
  0x57   : > { %1786 = vmatmul.msk.bf16.vlgmr.msrb.gmra.mxu1 %vm284_vm2, %v2083_v25 }
  0x5b   : > { %1789 = vmatmul.msk.bf16.vlgmr.msrb.gmra.mxu2 %vm284_vm2, %v2083_v25 }
  0x5f   : > { %1792 = vmatmul.msk.bf16.vlgmr.msrb.gmra.mxu3 %vm284_vm2, %v2083_v25  ;;  %v2186_v25 = vld [vmem:[%s2013_s19 + $0x2c] sm:$0x11] }
  0x60   : > { %v1091_v52 = vunpack.c.l.bf16 %v2186_v25  ;;  %v1092_v38 = vunpack.c.h.bf16 %v2186_v25 }
  0x66   : > { %1784 = vmatmul.msk.bf16.gmra.mxu0 %vm284_vm2, %v2107_v0 }
  0x67   : > { %1787 = vmatmul.msk.bf16.gmra.mxu1 %vm284_vm2, %v2107_v0 }
  0x6b   : > { %1790 = vmatmul.msk.bf16.gmra.mxu2 %vm284_vm2, %v2107_v0 }
  0x6f   : > { %v634_v48 = vpop.permute.xlu2 %633  ;;  %1793 = vmatmul.msk.bf16.gmra.mxu3 %vm284_vm2, %v2107_v0 }
  0x76   : > { %1785 = vmatmul.msk.bf16.gmra.mxu0 %vm284_vm2, %v2121_v1 }
  0x77   : > { %v2179_v49 = vpop.permute.xlu2 %643  ;;  %1788 = vmatmul.msk.bf16.gmra.mxu1 %vm284_vm2, %v2121_v1 }
  0x7b   : > { %1791 = vmatmul.msk.bf16.gmra.mxu2 %vm284_vm2, %v2121_v1 }
  0x7f   : > { %1794 = vmatmul.msk.bf16.gmra.mxu3 %vm284_vm2, %v2121_v1  ;;  %v1090_v1 = vunpack.c.h.bf16 %v2200_v60 }
  0x85   : > { %v2192_v51 = vpop.permute.xlu2 %1950 }
  0x86   : > { %v1953_v53 = vunpack.i.h.bf16 %v2192_v51  ;;  %v1952_v54 = vunpack.i.l.bf16 %v2192_v51  ;;  %v640_v55 = vpop.permute.xlu1 %639  ;;  %v1077_v51 = vpack.i.b16 %v1076_v32, %v1076_v32 }
  0x87   : > { %v636_v56 = vpop.permute.xlu0 %635 }
  0x88   : > { %v1132_v57 = vsel %vm1130_vm3, %v1952_v54, %v1953_v53  ;;  %v651_v58 = vsel %vm649_vm4, %v634_v48, %v636_v56 }
  0x89   : > { %v671_v61 = vand.u32 %v651_v58, %v2071_v59  ;;  %v1149_v62 = vmul.f32 %v1132_v57, %v217_v50  ;;  %v1158_v63 = vmul.f32 %v1132_v57, %v1091_v52  ;;  %v1079_v58 = vperm.slane %v1077_v51, 0 }
  0x8b   : > { %v1167_v0 = vpack.c.bf16 %v1158_v63, %v1149_v62  ;;  %722 = vmatpush.bf16.msra.mxu1 %v671_v61  ;;  %v2277_v61 = vld [vmem:[%s2013_s19 + $0x3c] sm:$0x11] }
  0x8d   : > { %1209 = vrot.lane.b32.xlu0 %v1167_v0, %s1975_s30  ;;  %v1115_v3 = vpop.permute.xlu2 %1114  ;;  %v1105_v0 = vunpack.c.l.bf16 %v1079_v58 }
  0x8e   : > { %v1131_v6 = vsel %vm1130_vm3, %v1115_v3, %v1952_v54  ;;  %v632_v7 = vpop.permute.xlu1 %631  ;;  %1852 = vmatmul.msk.bf16.vlgmr.msra.gmra.mxu1 %vm284_vm2, %v2209_v2  ;;  %v1147_v46 = vmul.f32 %v1115_v3, %v215_v44  ;;  %v1931_v44 = vld [vmem:[%s2756_s1 + $0x28] sm:$0xff] }
  0x8f   : > { %v1148_v50 = vmul.f32 %v1131_v6, %v216_v42  ;;  %v1157_v8 = vmul.f32 %v1131_v6, %v1090_v1  ;;  %v638_v9 = vpop.permute.xlu0 %637  ;;  %v650_v11 = vsel %vm649_vm4, %v632_v7, %v634_v48  ;;  %v1095_v1 = vunpack.c.l.bf16 %v2277_v61 }
  0x90   : > { %v652_v13 = vsel %vm649_vm4, %v636_v56, %v638_v9  ;;  %v653_v14 = vsel %vm649_vm4, %v638_v9, %v640_v55  ;;  %v668_v15 = vand.u32 %v650_v11, %v2071_v59  ;;  %v1094_v11 = vunpack.c.h.bf16 %v2236_v29 }
  0x91   : > { %v674_v16 = vand.u32 %v652_v13, %v2071_v59  ;;  %v677_v17 = vand.u32 %v653_v14, %v2071_v59  ;;  %v1166_v26 = vpack.c.bf16 %v1157_v8, %v1148_v50 }
  0x92   : > { %698 = vmatpush.bf16.msra.mxu0 %v668_v15 }
  0x93   : > { %746 = vmatpush.bf16.msra.mxu2 %v674_v16  ;;  %770 = vmatpush.bf16.msra.mxu3 %v677_v17 }
  0x95   : > { %1207 = vrot.lane.b32.xlu0 %v1166_v26, %s1975_s30  ;;  %1849 = vmatmul.msk.bf16.vlgmr.msra.gmra.mxu0 %vm284_vm2, %v2209_v2 }
  0x96   : > { %v648_v42 = vpop.permute.xlu1 %647  ;;  %1855 = vmatmul.msk.bf16.vlgmr.msra.gmra.mxu2 %vm284_vm2, %v2209_v2  ;;  %1858 = vmatmul.msk.bf16.vlgmr.msra.gmra.mxu3 %vm284_vm2, %v2209_v2 }
  0x97   : > { %v646_v18 = vpop.permute.xlu0 %645 }
  0x98   : > { %v656_v19 = vsel %vm649_vm4, %v2179_v49, %v646_v18  ;;  %v657_v20 = vsel %vm649_vm4, %v646_v18, %v648_v42 }
  0x99   : > { %v686_v22 = vand.u32 %v656_v19, %v2071_v59  ;;  %v689_v23 = vand.u32 %v657_v20, %v2071_v59 }
  0x9b   : > { %842 = vmatpush.bf16.msrb.mxu2 %v686_v22  ;;  %866 = vmatpush.bf16.msrb.mxu3 %v689_v23 }
  0x9e   : > { %v642_v31 = vpop.permute.xlu1 %641  ;;  %1853 = vmatmul.msk.bf16.gmra.mxu1 %vm284_vm2, %v2241_v30 }
  0x9f   : > { %v1956_v33 = vpop.permute.xlu0 %1955  ;;  %v654_v35 = vsel %vm649_vm4, %v640_v55, %v642_v31  ;;  %v655_v37 = vsel %vm649_vm4, %v642_v31, %v2179_v49 }
  0xa0   : > { %v1958_v39 = vunpack.i.h.bf16 %v1956_v33  ;;  %v1957_v40 = vunpack.i.l.bf16 %v1956_v33  ;;  %v680_v41 = vand.u32 %v654_v35, %v2071_v59  ;;  %v683_v43 = vand.u32 %v655_v37, %v2071_v59 }
  0xa2   : > { %v1133_v47 = vsel %vm1130_vm3, %v1953_v53, %v1957_v40  ;;  %v1134_v48 = vsel %vm1130_vm3, %v1957_v40, %v1958_v39  ;;  %818 = vmatpush.bf16.msrb.mxu1 %v683_v43  ;;  %794 = vmatpush.bf16.msrb.mxu0 %v680_v41 }
  0xa3   : > { %v1151_v49 = vmul.f32 %v1134_v48, %v219_v36  ;;  %v1160_v52 = vmul.f32 %v1134_v48, %v1093_v21  ;;  %v1150_v25 = vmul.f32 %v1133_v47, %v218_v4  ;;  %v1159_v54 = vmul.f32 %v1133_v47, %v1092_v38  ;;  %v2259_v55 = vpop.f32.mrf.mxu0 }
  0xa4   : > { %v2261_v56 = vpop.f32.mrf.mxu1  ;;  %v1156_v4 = vmul.f32 %v1115_v3, %v1089_v45 }
  0xa5   : > { %v1169_v57 = vpack.c.bf16 %v1160_v52, %v1151_v49  ;;  %v1168_v53 = vpack.c.bf16 %v1159_v54, %v1150_v25  ;;  %1850 = vmatmul.msk.bf16.gmra.mxu0 %vm284_vm2, %v2241_v30 }
  0xa6   : > { %1856 = vmatmul.msk.bf16.gmra.mxu2 %vm284_vm2, %v2241_v30  ;;  %1859 = vmatmul.msk.bf16.gmra.mxu3 %vm284_vm2, %v2241_v30  ;;  %v1165_v63 = vpack.c.bf16 %v1156_v4, %v1147_v46 }
  0xa7   : > { %v2271_v36 = vpop.permute.xlu0 %1960  ;;  %1213 = vrot.lane.b32.xlu2 %v1169_v57, %s1975_s30  ;;  %1211 = vrot.lane.b32.xlu1 %v1168_v53, %s1975_s30 }
  0xa8   : > { %v2760_v60 = vunpack.i.h.bf16 %v2271_v36  ;;  %v1962_v62 = vunpack.i.l.bf16 %v2271_v36 }
  0xaa   : > { %v1136_v34 = vsel %vm1130_vm3, %v1962_v62, %v2760_v60  ;;  %v1135_v14 = vsel %vm1130_vm3, %v1958_v39, %v1962_v62 }
  0xab   : > { %v2289_v6 = vpop.f32.mrf.mxu0  ;;  %v1153_v7 = vmul.f32 %v1136_v34, %v221_v27  ;;  %v1162_v50 = vmul.f32 %v1136_v34, %v1095_v1  ;;  %v1152_v16 = vmul.f32 %v1135_v14, %v220_v10  ;;  %v1161_v17 = vmul.f32 %v1135_v14, %v1094_v11  ;;  %v2407_v34 = vld [vmem:[%s2756_s1 + $0x30] sm:$0xff] }
  0xac   : > { %v2287_v3 = vpop.f32.mrf.mxu1 }
  0xad   : > { %v1171_v8 = vpack.c.bf16 %v1162_v50, %v1153_v7  ;;  %v1170_v26 = vpack.c.bf16 %v1161_v17, %v1152_v16 }
  0xae   : > { %1854 = vmatmul.msk.bf16.gmra.mxu1 %vm284_vm2, %v1931_v44  ;;  %v2300_v13 = vpop.f32.mrf.mxu2 }
  0xaf   : > { %1205 = vrot.lane.b32.xlu2 %v1165_v63, %s1975_s30  ;;  %1128 = vrot.lane.b32.xlu1 %v1105_v0, %s1974_s23 }
  0xb2   : > { %v2305_v15 = vpop.f32.mrf.mxu3 }
  0xb3   : > { %v2308_v27 = vpop.f32.mrf.mxu0 }
  0xb4   : > { %v2296_v9 = vpop.f32.mrf.mxu1 }
  0xb5   : > { %1851 = vmatmul.msk.bf16.gmra.mxu0 %vm284_vm2, %v1931_v44 }
  0xb6   : > { %1857 = vmatmul.msk.bf16.gmra.mxu2 %vm284_vm2, %v1931_v44  ;;  %1860 = vmatmul.msk.bf16.gmra.mxu3 %vm284_vm2, %v1931_v44  ;;  %v2317_v18 = vpop.f32.mrf.mxu2 }
  0xb7   : > { %1217 = vrot.lane.b32.xlu1 %v1171_v8, %s1975_s30 }
  0xba   : > { %v2319_v19 = vpop.f32.mrf.mxu3 }
  0xbb   : > { %v2321_v20 = vpop.f32.mrf.mxu0 }
  0xbc   : > { %v2312_v42 = vpop.f32.mrf.mxu1 }
  0xbe   : > { %1864 = vmatmul.msk.bf16.vlgmr.msrb.gmra.mxu1 %vm284_vm2, %v2209_v2  ;;  %v2331_v10 = vpop.f32.mrf.mxu2 }
  0xbf   : > { %1215 = vrot.lane.b32.xlu1 %v1170_v26, %s1975_s30 }
  0xc2   : > { %v2333_v22 = vpop.f32.mrf.mxu3 }
  0xc3   : > { %v2335_v23 = vpop.f32.mrf.mxu0 }
  0xc4   : > { %v2329_v5 = vpop.f32.mrf.mxu1 }
  0xc5   : > { %1861 = vmatmul.msk.bf16.vlgmr.msrb.gmra.mxu0 %vm284_vm2, %v2209_v2 }
  0xc6   : > { %1867 = vmatmul.msk.bf16.vlgmr.msrb.gmra.mxu2 %vm284_vm2, %v2209_v2  ;;  %1870 = vmatmul.msk.bf16.vlgmr.msrb.gmra.mxu3 %vm284_vm2, %v2209_v2  ;;  %v2341_v29 = vpop.f32.mrf.mxu2 }
  0xca   : > { %v2343_v31 = vpop.f32.mrf.mxu3 }
  0xcb   : > { %v2347_v2 = vpop.f32.mrf.mxu0 }
  0xcc   : > { %v2339_v24 = vpop.f32.mrf.mxu1 }
  0xce   : > { %1865 = vmatmul.msk.bf16.gmra.mxu1 %vm284_vm2, %v2241_v30  ;;  %v2355_v33 = vpop.f32.mrf.mxu2 }
  0xd2   : > { %v2358_v35 = vpop.f32.mrf.mxu3 }
  0xd3   : > { %2761 = vst [vmem:[#allocation3_spill] sm:$0xff] %v2358_v35  ;;  %v2360_v37 = vpop.f32.mrf.mxu0 }
  0xd4   : > { %v2353_v32 = vpop.f32.mrf.mxu1 }
  0xd5   : > { %1862 = vmatmul.msk.bf16.gmra.mxu0 %vm284_vm2, %v2241_v30 }
  0xd6   : > { %1868 = vmatmul.msk.bf16.gmra.mxu2 %vm284_vm2, %v2241_v30  ;;  %1871 = vmatmul.msk.bf16.gmra.mxu3 %vm284_vm2, %v2241_v30  ;;  %v2369_v30 = vpop.f32.mrf.mxu2 }
  0xd7   : > { %2763 = vst [vmem:[#allocation5_spill] sm:$0xff] %v2369_v30 }
  0xda   : > { %v2371_v39 = vpop.f32.mrf.mxu3 }
  0xdb   : > { %v2367_v38 = vpop.f32.mrf.mxu0  ;;  %2764 = vst [vmem:[#allocation6_spill] sm:$0xff] %v2371_v39 }
  0xdc   : > { %v2362_v21 = vpop.f32.mrf.mxu1  ;;  %2762 = vst [vmem:[#allocation4_spill] sm:$0xff] %v2367_v38 }
  0xde   : > { %1866 = vmatmul.msk.bf16.gmra.mxu1 %vm284_vm2, %v1931_v44  ;;  %v2377_v43 = vpop.f32.mrf.mxu2 }
  0xdf   : > { %2767 = vst [vmem:[#allocation9_spill] sm:$0xff] %v2377_v43 }
  0xe2   : > { %v2379_v45 = vpop.f32.mrf.mxu3 }
  0xe3   : > { %v2375_v41 = vpop.f32.mrf.mxu0  ;;  %2768 = vst [vmem:[#allocation10_spill] sm:$0xff] %v2379_v45 }
  0xe4   : > { %v2373_v40 = vpop.f32.mrf.mxu1  ;;  %2766 = vst [vmem:[#allocation8_spill] sm:$0xff] %v2375_v41 }
  0xe5   : > { %1863 = vmatmul.msk.bf16.gmra.mxu0 %vm284_vm2, %v1931_v44  ;;  %2765 = vst [vmem:[#allocation7_spill] sm:$0xff] %v2373_v40 }
  0xe6   : > { %1869 = vmatmul.msk.bf16.gmra.mxu2 %vm284_vm2, %v1931_v44  ;;  %1872 = vmatmul.msk.bf16.gmra.mxu3 %vm284_vm2, %v1931_v44  ;;  %v2385_v51 = vpop.f32.mrf.mxu2 }
  0xe7   : > { %2771 = vst [vmem:[#allocation13_spill] sm:$0xff] %v2385_v51 }
  0xea   : > { %v2387_v49 = vpop.f32.mrf.mxu3 }
  0xeb   : > { %v2383_v48 = vpop.f32.mrf.mxu0  ;;  %2772 = vst [vmem:[#allocation14_spill] sm:$0xff] %v2387_v49 }
  0xec   : > { %v2381_v47 = vpop.f32.mrf.mxu1  ;;  %2770 = vst [vmem:[#allocation12_spill] sm:$0xff] %v2383_v48 }
  0xed   : > { %2769 = vst [vmem:[#allocation11_spill] sm:$0xff] %v2381_v47 }
  0xee   : > { %v2395_v53 = vpop.f32.mrf.mxu2 }
  0xef   : > { %2775 = vst [vmem:[#allocation17_spill] sm:$0xff] %v2395_v53 }
  0xf2   : > { %v2397_v46 = vpop.f32.mrf.mxu3 }
  0xf3   : > { %v2393_v57 = vpop.f32.mrf.mxu0  ;;  %2776 = vst [vmem:[#allocation18_spill] sm:$0xff] %v2397_v46 }
  0xf4   : > { %v2389_v25 = vpop.f32.mrf.mxu1  ;;  %2774 = vst [vmem:[#allocation16_spill] sm:$0xff] %v2393_v57 }
  0xf5   : > { %2773 = vst [vmem:[#allocation15_spill] sm:$0xff] %v2389_v25 }
  0xf6   : > { %v2414_v50 = vpop.f32.mrf.mxu2 }
  0xf7   : > { %2779 = vst [vmem:[#allocation21_spill] sm:$0xff] %v2414_v50 }
  0xfa   : > { %v2418_v8 = vpop.f32.mrf.mxu3 }
  0xfb   : > { %v2410_v7 = vpop.f32.mrf.mxu0  ;;  %2780 = vst [vmem:[#allocation22_spill] sm:$0xff] %v2418_v8  ;;  %v1096_v8 = vunpack.c.h.bf16 %v2277_v61  ;;  %v2784_v61 = vunpack.c.h.bf16 %v2141_v12 }
  0xfc   : > { %v2401_v0 = vpop.f32.mrf.mxu1  ;;  %2778 = vst [vmem:[#allocation20_spill] sm:$0xff] %v2410_v7 }
  0xfd   : > { %2777 = vst [vmem:[#allocation19_spill] sm:$0xff] %v2401_v0 }
  0xfe   : > { %v2424_v17 = vpop.f32.mrf.mxu2 }
  0xff   : > { %v1210_v52 = vpop.permute.xlu0 %1209  ;;  %2781 = vst [vmem:[#allocation23_spill] sm:$0xff] %v2424_v17 }
 0x101   : > { %v2391_v54 = vpop.permute.xlu2 %1213 }
 0x106   : > { %v2458_v17 = vpop.f32.mrf.mxu2 }
 0x107   : > { %v1208_v4 = vpop.permute.xlu0 %1207  ;;  %2785 = vst [vmem:[#allocation25_spill] sm:$0xff] %v2458_v17 }
 0x108   : > { %v1225_v58 = vsel %vm1223_vm5, %v1208_v4, %v1210_v52 }
 0x109   : > { %v1245_v62 = vand.u32 %v1225_v58, %v2071_v59  ;;  %v1206_v63 = vpop.permute.xlu2 %1205  ;;  %v2432_v58 = vld [vmem:[%s2756_s1 + $0x38] sm:$0xff] }
 0x10a   : > { %v1224_v1 = vsel %vm1223_vm5, %v1206_v63, %v1208_v4 }
 0x10b   : > { %1296 = vmatpush.bf16.msra.mxu1 %v1245_v62  ;;  %v1242_v44 = vand.u32 %v1224_v1, %v2071_v59  ;;  %v2420_v11 = vpop.f32.mrf.mxu1  ;;  %v2434_v62 = vpop.f32.mrf.mxu3 }
 0x10c   : > { %2782 = vst [vmem:[#allocation24_spill] sm:$0xff] %v2434_v62 }
 0x10d   : > { %1272 = vmatpush.bf16.msra.mxu0 %v1242_v44  ;;  %v1031_v44 = vld [vmem:[%s2013_s19 + $0x20] sm:$0xf]  ;;  %s2588_s19 = scalar_lea.vmem %s2758_s3, %s1936_s16 }
 0x10e   : > { %1894 = vmatmul.msk.bf16.vlgmr.msra.gmra.mxu1 %vm284_vm2, %v2407_v34 }
 0x110   : > { %1891 = vmatmul.msk.bf16.vlgmr.msra.gmra.mxu0 %vm284_vm2, %v2407_v34 }
 0x112   : > { %v2422_v14 = vpop.f32.mrf.mxu0 }
 0x113   : > { %v2440_v60 = vpop.f32.mrf.mxu1  ;;  %v2460_v50 = vpop.f32.mrf.mxu3 }
 0x114   : > { %2786 = vst [vmem:[#allocation26_spill] sm:$0xff] %v2460_v50 }
 0x119   : > { %v1212_v16 = vpop.permute.xlu1 %1211 }
 0x11a   : > { %v1226_v26 = vsel %vm1223_vm5, %v1210_v52, %v1212_v16  ;;  %v1227_v4 = vsel %vm1223_vm5, %v1212_v16, %v2391_v54  ;;  %v1088_v52 = vunpack.c.l.bf16 %v1031_v44  ;;  %v1097_v16 = vunpack.c.l.bf16 %v1036_v28 }
 0x11b   : > { %v1248_v63 = vand.u32 %v1226_v26, %v2071_v59  ;;  %v1251_v1 = vand.u32 %v1227_v4, %v2071_v59  ;;  %v2451_v4 = vpop.f32.mrf.mxu0  ;;  %v2464_v53 = vpop.f32.mrf.mxu1 }
 0x11d   : > { %1320 = vmatpush.bf16.msra.mxu2 %v1248_v63  ;;  %1344 = vmatpush.bf16.msra.mxu3 %v1251_v1  ;;  %v2783_v63 = vunpack.i.h.bf16 %v2271_v36 }
 0x11e   : > { %1895 = vmatmul.msk.bf16.gmra.mxu1 %vm284_vm2, %v2432_v58 }
 0x120   : > { %1892 = vmatmul.msk.bf16.gmra.mxu0 %vm284_vm2, %v2432_v58  ;;  %1897 = vmatmul.msk.bf16.vlgmr.msra.gmra.mxu2 %vm284_vm2, %v2407_v34 }
 0x121   : > { %1900 = vmatmul.msk.bf16.vlgmr.msra.gmra.mxu3 %vm284_vm2, %v2407_v34  ;;  %v1129_v26 = vpop.permute.xlu1 %1128 }
 0x122   : > { %v1137_v1 = vsel %vm1130_vm3, %v2783_v63, %v1129_v26  ;;  %v1155_v44 = vmul.f32 %v1129_v26, %v1088_v52  ;;  %v1164_v28 = vmul.f32 %v1129_v26, %v1097_v16  ;;  %v2469_v52 = vld [vmem:[%s2756_s1 + $0x40] sm:$0xff] }
 0x123   : > { %v1154_v62 = vmul.f32 %v1137_v1, %v2784_v61  ;;  %v1163_v46 = vmul.f32 %v1137_v1, %v1096_v8  ;;  %v2471_v12 = vpop.f32.mrf.mxu0  ;;  %v2473_v8 = vpop.f32.mrf.mxu2 }
 0x124   : > { %v1173_v49 = vpack.c.bf16 %v1164_v28, %v1155_v44 }
 0x125   : > { %v1172_v45 = vpack.c.bf16 %v1163_v46, %v1154_v62  ;;  %v2477_v46 = vpop.f32.mrf.mxu3 }
 0x126   : > { %1221 = vrot.lane.b32.xlu0 %v1173_v49, %s1975_s30  ;;  %v2485_v49 = vpop.f32.mrf.mxu1 }
 0x127   : > { %1219 = vrot.lane.b32.xlu2 %v1172_v45, %s1975_s30 }
 0x129   : > { %v1218_v36 = vpop.permute.xlu1 %1217 }
 0x12b   : > { %v2492_v1 = vpop.f32.mrf.mxu0  ;;  %v2494_v44 = vpop.f32.mrf.mxu2 }
 0x12d   : > { %v2496_v28 = vpop.f32.mrf.mxu3 }
 0x12e   : > { %1896 = vmatmul.msk.bf16.gmra.mxu1 %vm284_vm2, %v2469_v52  ;;  %v2498_v61 = vpop.f32.mrf.mxu1 }
 0x130   : > { %1893 = vmatmul.msk.bf16.gmra.mxu0 %vm284_vm2, %v2469_v52  ;;  %1898 = vmatmul.msk.bf16.gmra.mxu2 %vm284_vm2, %v2432_v58 }
 0x131   : > { %1901 = vmatmul.msk.bf16.gmra.mxu3 %vm284_vm2, %v2432_v58  ;;  %v1216_v45 = vpop.permute.xlu1 %1215 }
 0x132   : > { %v1228_v62 = vsel %vm1223_vm5, %v2391_v54, %v1216_v45  ;;  %v1229_v16 = vsel %vm1223_vm5, %v1216_v45, %v1218_v36 }
 0x133   : > { %v1254_v26 = vand.u32 %v1228_v62, %v2071_v59  ;;  %v1257_v63 = vand.u32 %v1229_v16, %v2071_v59  ;;  %v2502_v54 = vpop.f32.mrf.mxu0  ;;  %v2510_v45 = vpop.f32.mrf.mxu2 }
 0x135   : > { %1368 = vmatpush.bf16.msrb.mxu0 %v1254_v26  ;;  %1392 = vmatpush.bf16.msrb.mxu1 %v1257_v63  ;;  %v2512_v62 = vpop.f32.mrf.mxu3 }
 0x136   : > { %v2514_v16 = vpop.f32.mrf.mxu1 }
 0x13b   : > { %v2516_v26 = vpop.f32.mrf.mxu0  ;;  %v2518_v63 = vpop.f32.mrf.mxu2 }
 0x13d   : > { %v2520_v50 = vpop.f32.mrf.mxu3 }
 0x13e   : > { %1906 = vmatmul.msk.bf16.vlgmr.msrb.gmra.mxu1 %vm284_vm2, %v2407_v34  ;;  %v2524_v17 = vpop.f32.mrf.mxu1 }
 0x140   : > { %1899 = vmatmul.msk.bf16.gmra.mxu2 %vm284_vm2, %v2469_v52  ;;  %1903 = vmatmul.msk.bf16.vlgmr.msrb.gmra.mxu0 %vm284_vm2, %v2407_v34 }
 0x141   : > { %1902 = vmatmul.msk.bf16.gmra.mxu3 %vm284_vm2, %v2469_v52 }
 0x143   : > { %v2528_v51 = vpop.f32.mrf.mxu0  ;;  %v2530_v43 = vpop.f32.mrf.mxu2 }
 0x145   : > { %v2532_v7 = vpop.f32.mrf.mxu3 }
 0x146   : > { %2787 = vst [vmem:[#allocation27_spill] sm:$0xff] %v2532_v7  ;;  %v2534_v0 = vpop.f32.mrf.mxu1 }
 0x14b   : > { %v2536_v57 = vpop.f32.mrf.mxu0  ;;  %v2540_v25 = vpop.f32.mrf.mxu2 }
 0x14c   : > { %2788 = vst [vmem:[#allocation28_spill] sm:$0xff] %v2536_v57 }
 0x14d   : > { %2789 = vst [vmem:[#allocation29_spill] sm:$0xff] %v2540_v25  ;;  %v2544_v48 = vpop.f32.mrf.mxu3 }
 0x14e   : > { %1907 = vmatmul.msk.bf16.gmra.mxu1 %vm284_vm2, %v2432_v58  ;;  %2790 = vst [vmem:[#allocation30_spill] sm:$0xff] %v2544_v48  ;;  %v2546_v47 = vpop.f32.mrf.mxu1 }
 0x14f   : > { %2791 = vst [vmem:[#allocation31_spill] sm:$0xff] %v2546_v47 }
 0x150   : > { %1904 = vmatmul.msk.bf16.gmra.mxu0 %vm284_vm2, %v2432_v58 }
 0x153   : > { %v2548_v41 = vpop.f32.mrf.mxu0  ;;  %v2550_v39 = vpop.f32.mrf.mxu2 }
 0x154   : > { %2792 = vst [vmem:[#allocation32_spill] sm:$0xff] %v2548_v41 }
 0x155   : > { %2793 = vst [vmem:[#allocation33_spill] sm:$0xff] %v2550_v39  ;;  %v2552_v30 = vpop.f32.mrf.mxu3 }
 0x156   : > { %2794 = vst [vmem:[#allocation34_spill] sm:$0xff] %v2552_v30  ;;  %v2554_v40 = vpop.f32.mrf.mxu1 }
 0x157   : > { %2795 = vst [vmem:[#allocation35_spill] sm:$0xff] %v2554_v40 }
 0x15b   : > { %v2556_v57 = vpop.f32.mrf.mxu0  ;;  %v2558_v38 = vpop.f32.mrf.mxu2 }
 0x15c   : > { %2796 = vst [vmem:[#allocation36_spill] sm:$0xff] %v2556_v57 }
 0x15d   : > { %2797 = vst [vmem:[#allocation37_spill] sm:$0xff] %v2558_v38  ;;  %v2560_v25 = vpop.f32.mrf.mxu3 }
 0x15e   : > { %1908 = vmatmul.msk.bf16.gmra.mxu1 %vm284_vm2, %v2469_v52  ;;  %2798 = vst [vmem:[#allocation38_spill] sm:$0xff] %v2560_v25  ;;  %v2562_v7 = vpop.f32.mrf.mxu1 }
 0x15f   : > { %2799 = vst [vmem:[#allocation39_spill] sm:$0xff] %v2562_v7 }
 0x160   : > { %1905 = vmatmul.msk.bf16.gmra.mxu0 %vm284_vm2, %v2469_v52 }
 0x163   : > { %v2564_v48 = vpop.f32.mrf.mxu0  ;;  %v2566_v47 = vpop.f32.mrf.mxu2 }
 0x164   : > { %2800 = vst [vmem:[#allocation40_spill] sm:$0xff] %v2564_v48 }
 0x165   : > { %2801 = vst [vmem:[#allocation41_spill] sm:$0xff] %v2566_v47  ;;  %v2568_v41 = vpop.f32.mrf.mxu3 }
 0x166   : > { %2802 = vst [vmem:[#allocation42_spill] sm:$0xff] %v2568_v41  ;;  %v2570_v39 = vpop.f32.mrf.mxu1  ;;  %v932_v41 = vadd.f32 %v2420_v11, %v2261_v56  ;;  %v940_v56 = vadd.f32 %v2440_v60, %v2287_v3  ;;  %v948_v60 = vadd.f32 %v2464_v53, %v2296_v9  ;;  %v933_v9 = vadd.f32 %v2473_v8, %v2300_v13 }
 0x167   : > { %2803 = vst [vmem:[#allocation43_spill] sm:$0xff] %v2570_v39  ;;  %v939_v39 = vadd.f32 %v2451_v4, %v2289_v6  ;;  %v955_v4 = vadd.f32 %v2492_v1, %v2321_v20  ;;  %v964_v13 = vadd.f32 %v2498_v61, %v2329_v5  ;;  %v950_v5 = vadd.f32 %v2512_v62, %v2333_v22 }
 0x168   : > { %v957_v22 = vadd.f32 %v2518_v63, %v2341_v29  ;;  %v935_v62 = vadd.f32 %v2528_v51, %v2360_v37  ;;  %v944_v29 = vadd.f32 %v2534_v0, %v2362_v21  ;;  %v2808_v37 = vld [vmem:[#allocation27_spill] sm:$0xff]  ;;  %v2809_v63 = vld [vmem:[#allocation4_spill] sm:$0xff]  ;;  %v2813_v0 = vld [vmem:[#allocation5_spill] sm:$0xff] }
 0x169   : > { %v2812_v21 = vld [vmem:[#allocation31_spill] sm:$0xff] }
 0x16b   : > { %v2574_v57 = vpop.f32.mrf.mxu0  ;;  %v2577_v25 = vpop.f32.mrf.mxu2 }
 0x16c   : > { %2804 = vst [vmem:[#allocation44_spill] sm:$0xff] %v2574_v57 }
 0x16d   : > { %2805 = vst [vmem:[#allocation45_spill] sm:$0xff] %v2577_v25  ;;  %v2581_v38 = vpop.f32.mrf.mxu3 }
 0x16e   : > { %2806 = vst [vmem:[#allocation46_spill] sm:$0xff] %v2581_v38 }
 0x173   : > { %v2594_v47 = vpop.f32.mrf.mxu2 }
 0x175   : > { %v2598_v11 = vpop.f32.mrf.mxu3 }
 0x17b   : > { %v2610_v6 = vpop.f32.mrf.mxu2 }
 0x181   : > { %v1220_v35 = vpop.permute.xlu2 %1219 }
 0x182   : > { %v1230_v30 = vsel %vm1223_vm5, %v1218_v36, %v1220_v35 }
 0x183   : > { %v1260_v40 = vand.u32 %v1230_v30, %v2071_v59 }
 0x185   : > { %1416 = vmatpush.bf16.msrb.mxu2 %v1260_v40  ;;  %v931_v40 = vadd.f32 %v2422_v14, %v2259_v55 }
 0x188   : > { %1909 = vmatmul.msk.bf16.vlgmr.msrb.gmra.mxu2 %vm284_vm2, %v2407_v34 }
 0x18b   : > { %v1298_v30 = vpop.f32.mrf.mxu1 }
 0x18c   : > { %v1506_v36 = vadd.f32 %v1298_v30, %v932_v41 }
 0x18d   : > { %v1274_v25 = vpop.f32.mrf.mxu0 }
 0x18e   : > { %1650 = vst [vmem:[%s2588_s19 + $0x8] sm:$0xff] %v1506_v36  ;;  %v1505_v38 = vadd.f32 %v1274_v25, %v931_v40 }
 0x190   : > { %1649 = vst [vmem:[%s2588_s19] sm:$0xff] %v1505_v38 }
 0x193   : > { %v1300_v57 = vpop.f32.mrf.mxu1 }
 0x194   : > { %v1514_v48 = vadd.f32 %v1300_v57, %v940_v56  ;;  %v2614_v57 = vpop.f32.mrf.mxu3 }
 0x195   : > { %v1276_v7 = vpop.f32.mrf.mxu0 }
 0x196   : > { %1658 = vst [vmem:[%s2588_s19 + $0x48] sm:$0xff] %v1514_v48  ;;  %v1513_v55 = vadd.f32 %v1276_v7, %v939_v39  ;;  %v947_v48 = vadd.f32 %v2471_v12, %v2308_v27  ;;  %v934_v27 = vadd.f32 %v2477_v46, %v2305_v15  ;;  %v941_v15 = vadd.f32 %v2494_v44, %v2317_v18 }
 0x197   : > { %v963_v46 = vadd.f32 %v2502_v54, %v2335_v23  ;;  %v972_v18 = vadd.f32 %v2514_v16, %v2339_v24  ;;  %v958_v24 = vadd.f32 %v2520_v50, %v2343_v31  ;;  %v965_v31 = vadd.f32 %v2530_v43, %v2355_v33  ;;  %v2811_v33 = vld [vmem:[#allocation7_spill] sm:$0xff] }
 0x198   : > { %1657 = vst [vmem:[%s2588_s19 + $0x40] sm:$0xff] %v1513_v55  ;;  %v1222_v41 = vpop.permute.xlu0 %1221  ;;  %1910 = vmatmul.msk.bf16.gmra.mxu2 %vm284_vm2, %v2432_v58  ;;  %v952_v43 = vadd.f32 %v2812_v21, %v2811_v33  ;;  %v2835_v33 = vld [vmem:[#allocation17_spill] sm:$0xff] }
 0x199   : > { %v1231_v38 = vsel %vm1223_vm5, %v1220_v35, %v1222_v41  ;;  %v2836_v21 = vld [vmem:[#allocation41_spill] sm:$0xff] }
 0x19a   : > { %v1263_v3 = vand.u32 %v1231_v38, %v2071_v59  ;;  %v956_v59 = vadd.f32 %v2485_v49, %v2312_v42  ;;  %v942_v42 = vadd.f32 %v2496_v28, %v2319_v19  ;;  %v949_v19 = vadd.f32 %v2510_v45, %v2331_v10 }
 0x19b   : > { %v1303_v25 = vpop.f32.mrf.mxu1  ;;  %v971_v28 = vadd.f32 %v2516_v26, %v2347_v2  ;;  %v936_v10 = vadd.f32 %v2524_v17, %v2353_v32  ;;  %v2807_v32 = vld [vmem:[#allocation3_spill] sm:$0xff] }
 0x19c   : > { %v1522_v39 = vadd.f32 %v1303_v25, %v948_v60  ;;  %1440 = vmatpush.bf16.msrb.mxu3 %v1263_v3  ;;  %v966_v51 = vadd.f32 %v2808_v37, %v2807_v32 }
 0x19d   : > { %v1279_v7 = vpop.f32.mrf.mxu0 }
 0x19e   : > { %1666 = vst [vmem:[%s2588_s19 + $0x88] sm:$0xff] %v1522_v39  ;;  %v1521_v14 = vadd.f32 %v1279_v7, %v947_v48 }
 0x19f   : > { %1912 = vmatmul.msk.bf16.vlgmr.msrb.gmra.mxu3 %vm284_vm2, %v2407_v34 }
 0x1a0   : > { %1665 = vst [vmem:[%s2588_s19 + $0x80] sm:$0xff] %v1521_v14 }
 0x1a3   : > { %v1305_v35 = vpop.f32.mrf.mxu1  ;;  %v1322_v53 = vpop.f32.mrf.mxu2 }
 0x1a4   : > { %v1530_v12 = vadd.f32 %v1305_v35, %v956_v59  ;;  %v1507_v30 = vadd.f32 %v1322_v53, %v933_v9  ;;  %v1346_v34 = vpop.f32.mrf.mxu3  ;;  %v2810_v9 = vld [vmem:[#allocation28_spill] sm:$0xff] }
 0x1a5   : > { %v1508_v40 = vadd.f32 %v1346_v34, %v934_v27  ;;  %v1281_v36 = vpop.f32.mrf.mxu0  ;;  %v943_v27 = vadd.f32 %v2810_v9, %v2809_v63  ;;  %v2814_v34 = vld [vmem:[#allocation29_spill] sm:$0xff] }
 0x1a6   : > { %1674 = vst [vmem:[%s2588_s19 + $0xc8] sm:$0xff] %v1530_v12  ;;  %v1529_v56 = vadd.f32 %v1281_v36, %v955_v4  ;;  %v2815_v36 = vld [vmem:[#allocation6_spill] sm:$0xff]  ;;  %v2832_v63 = vld [vmem:[#allocation33_spill] sm:$0xff] }
 0x1a7   : > { %1651 = vst [vmem:[%s2588_s19 + $0x10] sm:$0xff] %v1507_v30 }
 0x1a8   : > { %1652 = vst [vmem:[%s2588_s19 + $0x18] sm:$0xff] %v1508_v40  ;;  %1911 = vmatmul.msk.bf16.gmra.mxu2 %vm284_vm2, %v2469_v52  ;;  %v973_v40 = vadd.f32 %v2814_v34, %v2813_v0 }
 0x1a9   : > { %1673 = vst [vmem:[%s2588_s19 + $0xc0] sm:$0xff] %v1529_v56  ;;  %v2816_v56 = vld [vmem:[#allocation30_spill] sm:$0xff] }
 0x1ab   : > { %v1308_v20 = vpop.f32.mrf.mxu1  ;;  %v1324_v8 = vpop.f32.mrf.mxu2 }
 0x1ac   : > { %v1538_v49 = vadd.f32 %v1308_v20, %v964_v13  ;;  %v1515_v1 = vadd.f32 %v1324_v8, %v941_v15  ;;  %v1348_v55 = vpop.f32.mrf.mxu3  ;;  %v974_v13 = vadd.f32 %v2816_v56, %v2815_v36  ;;  %v2817_v20 = vld [vmem:[#allocation8_spill] sm:$0xff]  ;;  %v2838_v36 = vld [vmem:[#allocation34_spill] sm:$0xff] }
 0x1ad   : > { %v1516_v41 = vadd.f32 %v1348_v55, %v942_v42  ;;  %v1284_v38 = vpop.f32.mrf.mxu0  ;;  %v2818_v8 = vld [vmem:[#allocation32_spill] sm:$0xff] }
 0x1ae   : > { %1682 = vst [vmem:[%s2588_s19 + $0x108] sm:$0xff] %v1538_v49  ;;  %v1537_v60 = vadd.f32 %v1284_v38, %v963_v46  ;;  %v951_v46 = vadd.f32 %v2818_v8, %v2817_v20 }
 0x1af   : > { %1659 = vst [vmem:[%s2588_s19 + $0x50] sm:$0xff] %v1515_v1  ;;  %1913 = vmatmul.msk.bf16.gmra.mxu3 %vm284_vm2, %v2432_v58 }
 0x1b0   : > { %1660 = vst [vmem:[%s2588_s19 + $0x58] sm:$0xff] %v1516_v41 }
 0x1b1   : > { %1681 = vst [vmem:[%s2588_s19 + $0x100] sm:$0xff] %v1537_v60 }
 0x1b3   : > { %v1310_v23 = vpop.f32.mrf.mxu1  ;;  %v1327_v44 = vpop.f32.mrf.mxu2 }
 0x1b4   : > { %v1546_v58 = vadd.f32 %v1310_v23, %v972_v18  ;;  %v1523_v61 = vadd.f32 %v1327_v44, %v949_v19  ;;  %v1351_v54 = vpop.f32.mrf.mxu3  ;;  %v2819_v18 = vld [vmem:[#allocation11_spill] sm:$0xff]  ;;  %v2821_v44 = vld [vmem:[#allocation12_spill] sm:$0xff] }
 0x1b5   : > { %v1524_v3 = vadd.f32 %v1351_v54, %v950_v5  ;;  %v1286_v25 = vpop.f32.mrf.mxu0  ;;  %v2820_v19 = vld [vmem:[#allocation35_spill] sm:$0xff] }
 0x1b6   : > { %1690 = vst [vmem:[%s2588_s19 + $0x148] sm:$0xff] %v1546_v58  ;;  %v1545_v48 = vadd.f32 %v1286_v25, %v971_v28  ;;  %v960_v5 = vadd.f32 %v2820_v19, %v2819_v18  ;;  %v2822_v28 = vld [vmem:[#allocation36_spill] sm:$0xff]  ;;  %v2823_v25 = vld [vmem:[#allocation15_spill] sm:$0xff] }
 0x1b7   : > { %1667 = vst [vmem:[%s2588_s19 + $0x90] sm:$0xff] %v1523_v61  ;;  %v959_v58 = vadd.f32 %v2822_v28, %v2821_v44  ;;  %v2844_v44 = vld [vmem:[#allocation18_spill] sm:$0xff] }
 0x1b8   : > { %1668 = vst [vmem:[%s2588_s19 + $0x98] sm:$0xff] %v1524_v3  ;;  %v2845_v28 = vld [vmem:[#allocation42_spill] sm:$0xff] }
 0x1b9   : > { %1689 = vst [vmem:[%s2588_s19 + $0x140] sm:$0xff] %v1545_v48  ;;  %v2824_v48 = vld [vmem:[#allocation39_spill] sm:$0xff] }
 0x1bb   : > { %v1394_v2 = vpop.f32.mrf.mxu1  ;;  %v1329_v45 = vpop.f32.mrf.mxu2 }
 0x1bc   : > { %v1510_v16 = vadd.f32 %v1394_v2, %v936_v10  ;;  %v1531_v26 = vadd.f32 %v1329_v45, %v957_v22  ;;  %v1353_v39 = vpop.f32.mrf.mxu3  ;;  %v968_v10 = vadd.f32 %v2824_v48, %v2823_v25  ;;  %v2826_v2 = vld [vmem:[#allocation40_spill] sm:$0xff] }
 0x1bd   : > { %v1532_v7 = vadd.f32 %v1353_v39, %v958_v24  ;;  %v1370_v14 = vpop.f32.mrf.mxu0  ;;  %v2825_v24 = vld [vmem:[#allocation16_spill] sm:$0xff]  ;;  %v2827_v39 = vld [vmem:[#allocation19_spill] sm:$0xff] }
 0x1be   : > { %1654 = vst [vmem:[%s2588_s19 + $0x28] sm:$0xff] %v1510_v16  ;;  %v1509_v59 = vadd.f32 %v1370_v14, %v935_v62  ;;  %v967_v45 = vadd.f32 %v2826_v2, %v2825_v24 }
 0x1bf   : > { %1675 = vst [vmem:[%s2588_s19 + $0xd0] sm:$0xff] %v1531_v26  ;;  %1914 = vmatmul.msk.bf16.gmra.mxu3 %vm284_vm2, %v2469_v52 }
 0x1c0   : > { %1676 = vst [vmem:[%s2588_s19 + $0xd8] sm:$0xff] %v1532_v7  ;;  %v2828_v7 = vld [vmem:[#allocation43_spill] sm:$0xff] }
 0x1c1   : > { %1653 = vst [vmem:[%s2588_s19 + $0x20] sm:$0xff] %v1509_v59  ;;  %v976_v14 = vadd.f32 %v2828_v7, %v2827_v39 }
 0x1c3   : > { %v1396_v50 = vpop.f32.mrf.mxu1  ;;  %v1332_v17 = vpop.f32.mrf.mxu2 }
 0x1c4   : > { %v1518_v52 = vadd.f32 %v1396_v50, %v944_v29  ;;  %v1539_v35 = vadd.f32 %v1332_v17, %v965_v31  ;;  %v1356_v53 = vpop.f32.mrf.mxu3  ;;  %v2829_v29 = vld [vmem:[#allocation20_spill] sm:$0xff]  ;;  %v2831_v17 = vld [vmem:[#allocation9_spill] sm:$0xff] }
 0x1c5   : > { %v1540_v4 = vadd.f32 %v1356_v53, %v966_v51  ;;  %v1372_v12 = vpop.f32.mrf.mxu0  ;;  %v2830_v31 = vld [vmem:[#allocation44_spill] sm:$0xff]  ;;  %v937_v9 = vadd.f32 %v2832_v63, %v2831_v17  ;;  %v2834_v53 = vld [vmem:[#allocation37_spill] sm:$0xff] }
 0x1c6   : > { %1662 = vst [vmem:[%s2588_s19 + $0x68] sm:$0xff] %v1518_v52  ;;  %v1517_v30 = vadd.f32 %v1372_v12, %v943_v27  ;;  %v975_v32 = vadd.f32 %v2830_v31, %v2829_v29 }
 0x1c7   : > { %1683 = vst [vmem:[%s2588_s19 + $0x110] sm:$0xff] %v1539_v35  ;;  %v2833_v35 = vld [vmem:[#allocation13_spill] sm:$0xff] }
 0x1c8   : > { %1684 = vst [vmem:[%s2588_s19 + $0x118] sm:$0xff] %v1540_v4  ;;  %v945_v4 = vadd.f32 %v2834_v53, %v2833_v35 }
 0x1c9   : > { %1661 = vst [vmem:[%s2588_s19 + $0x60] sm:$0xff] %v1517_v30 }
 0x1cb   : > { %v1399_v15 = vpop.f32.mrf.mxu1  ;;  %v1334_v42 = vpop.f32.mrf.mxu2 }
 0x1cc   : > { %v1526_v49 = vadd.f32 %v1399_v15, %v952_v43  ;;  %v1547_v1 = vadd.f32 %v1334_v42, %v973_v40  ;;  %v1358_v55 = vpop.f32.mrf.mxu3  ;;  %v953_v43 = vadd.f32 %v2836_v21, %v2835_v33  ;;  %v2837_v40 = vld [vmem:[#allocation10_spill] sm:$0xff]  ;;  %v2840_v15 = vld [vmem:[#allocation45_spill] sm:$0xff] }
 0x1cd   : > { %v1548_v41 = vadd.f32 %v1358_v55, %v974_v13  ;;  %v1375_v38 = vpop.f32.mrf.mxu0  ;;  %v938_v56 = vadd.f32 %v2838_v36, %v2837_v40  ;;  %v2839_v13 = vld [vmem:[#allocation21_spill] sm:$0xff]  ;;  %v2842_v55 = vld [vmem:[#allocation38_spill] sm:$0xff] }
 0x1ce   : > { %1670 = vst [vmem:[%s2588_s19 + $0xa8] sm:$0xff] %v1526_v49  ;;  %v1525_v60 = vadd.f32 %v1375_v38, %v951_v46  ;;  %v961_v42 = vadd.f32 %v2840_v15, %v2839_v13  ;;  %v2843_v38 = vld [vmem:[#allocation23_spill] sm:$0xff] }
 0x1cf   : > { %1691 = vst [vmem:[%s2588_s19 + $0x150] sm:$0xff] %v1547_v1  ;;  %v2841_v1 = vld [vmem:[#allocation14_spill] sm:$0xff] }
 0x1d0   : > { %1692 = vst [vmem:[%s2588_s19 + $0x158] sm:$0xff] %v1548_v41  ;;  %v946_v41 = vadd.f32 %v2842_v55, %v2841_v1 }
 0x1d1   : > { %1669 = vst [vmem:[%s2588_s19 + $0xa0] sm:$0xff] %v1525_v60  ;;  %v969_v60 = vadd.f32 %v2594_v47, %v2843_v38  ;;  %v2847_v47 = vld [vmem:[#allocation22_spill] sm:$0xff] }
 0x1d3   : > { %v1401_v23 = vpop.f32.mrf.mxu1 }
 0x1d4   : > { %v1534_v61 = vadd.f32 %v1401_v23, %v960_v5 }
 0x1d5   : > { %v1377_v54 = vpop.f32.mrf.mxu0 }
 0x1d6   : > { %1678 = vst [vmem:[%s2588_s19 + $0xe8] sm:$0xff] %v1534_v61  ;;  %v1533_v3 = vadd.f32 %v1377_v54, %v959_v58  ;;  %v954_v58 = vadd.f32 %v2845_v28, %v2844_v44  ;;  %v2846_v61 = vld [vmem:[#allocation25_spill] sm:$0xff] }
 0x1d7   : > { %v977_v54 = vadd.f32 %v2610_v6, %v2846_v61  ;;  %v2850_v6 = vld [vmem:[#allocation26_spill] sm:$0xff] }
 0x1d8   : > { %1677 = vst [vmem:[%s2588_s19 + $0xe0] sm:$0xff] %v1533_v3  ;;  %v978_v7 = vadd.f32 %v2614_v57, %v2850_v6 }
 0x1db   : > { %v1404_v22 = vpop.f32.mrf.mxu1 }
 0x1dc   : > { %v1542_v62 = vadd.f32 %v1404_v22, %v968_v10  ;;  %v2848_v22 = vld [vmem:[#allocation46_spill] sm:$0xff] }
 0x1dd   : > { %v1380_v16 = vpop.f32.mrf.mxu0  ;;  %v962_v24 = vadd.f32 %v2848_v22, %v2847_v47 }
 0x1de   : > { %1686 = vst [vmem:[%s2588_s19 + $0x128] sm:$0xff] %v1542_v62  ;;  %v1541_v26 = vadd.f32 %v1380_v16, %v967_v45  ;;  %v2849_v62 = vld [vmem:[#allocation24_spill] sm:$0xff] }
 0x1df   : > { %v970_v16 = vadd.f32 %v2598_v11, %v2849_v62 }
 0x1e0   : > { %1685 = vst [vmem:[%s2588_s19 + $0x120] sm:$0xff] %v1541_v26 }
 0x1e3   : > { %v1406_v59 = vpop.f32.mrf.mxu1 }
 0x1e4   : > { %v1550_v37 = vadd.f32 %v1406_v59, %v976_v14 }
 0x1e5   : > { %v1382_v51 = vpop.f32.mrf.mxu0 }
 0x1e6   : > { %1694 = vst [vmem:[%s2588_s19 + $0x168] sm:$0xff] %v1550_v37  ;;  %v1549_v50 = vadd.f32 %v1382_v51, %v975_v32 }
 0x1e8   : > { %1693 = vst [vmem:[%s2588_s19 + $0x160] sm:$0xff] %v1549_v50 }
 0x20b   : > { %v1418_v27 = vpop.f32.mrf.mxu2 }
 0x20c   : > { %v1511_v52 = vadd.f32 %v1418_v27, %v937_v9 }
 0x20e   : > { %1655 = vst [vmem:[%s2588_s19 + $0x30] sm:$0xff] %v1511_v52 }
 0x213   : > { %v1420_v12 = vpop.f32.mrf.mxu2 }
 0x214   : > { %v1519_v30 = vadd.f32 %v1420_v12, %v945_v4 }
 0x216   : > { %1663 = vst [vmem:[%s2588_s19 + $0x70] sm:$0xff] %v1519_v30 }
 0x21b   : > { %v1423_v0 = vpop.f32.mrf.mxu2 }
 0x21c   : > { %v1527_v34 = vadd.f32 %v1423_v0, %v953_v43 }
 0x21e   : > { %1671 = vst [vmem:[%s2588_s19 + $0xb0] sm:$0xff] %v1527_v34 }
 0x222   : > { %v1442_v20 = vpop.f32.mrf.mxu3 }
 0x223   : > { %v1512_v8 = vadd.f32 %v1442_v20, %v938_v56  ;;  %v1425_v46 = vpop.f32.mrf.mxu2 }
 0x224   : > { %v1535_v49 = vadd.f32 %v1425_v46, %v961_v42 }
 0x225   : > { %1656 = vst [vmem:[%s2588_s19 + $0x38] sm:$0xff] %v1512_v8 }
 0x226   : > { %1679 = vst [vmem:[%s2588_s19 + $0xf0] sm:$0xff] %v1535_v49 }
 0x22a   : > { %v1444_v18 = vpop.f32.mrf.mxu3 }
 0x22b   : > { %v1520_v19 = vadd.f32 %v1444_v18, %v946_v41  ;;  %v1428_v5 = vpop.f32.mrf.mxu2 }
 0x22c   : > { %v1543_v23 = vadd.f32 %v1428_v5, %v969_v60 }
 0x22d   : > { %1664 = vst [vmem:[%s2588_s19 + $0x78] sm:$0xff] %v1520_v19 }
 0x22e   : > { %1687 = vst [vmem:[%s2588_s19 + $0x130] sm:$0xff] %v1543_v23 }
 0x232   : > { %v1447_v3 = vpop.f32.mrf.mxu3 }
 0x233   : > { %v1528_v25 = vadd.f32 %v1447_v3, %v954_v58  ;;  %v1430_v48 = vpop.f32.mrf.mxu2 }
 0x234   : > { %v1551_v10 = vadd.f32 %v1430_v48, %v977_v54 }
 0x235   : > { %1672 = vst [vmem:[%s2588_s19 + $0xb8] sm:$0xff] %v1528_v25 }
 0x236   : > { %1695 = vst [vmem:[%s2588_s19 + $0x170] sm:$0xff] %v1551_v10 }
 0x23a   : > { %v1449_v2 = vpop.f32.mrf.mxu3 }
 0x23b   : > { %v1536_v45 = vadd.f32 %v1449_v2, %v962_v24 }
 0x23d   : > { %1680 = vst [vmem:[%s2588_s19 + $0xf8] sm:$0xff] %v1536_v45 }
 0x242   : > { %v1452_v26 = vpop.f32.mrf.mxu3 }
 0x243   : > { %v1544_v39 = vadd.f32 %v1452_v26, %v970_v16 }
 0x245   : > { %1688 = vst [vmem:[%s2588_s19 + $0x138] sm:$0xff] %v1544_v39 }
 0x24a   : > { %v1454_v14 = vpop.f32.mrf.mxu3 }
 0x24b   : > { %v1552_v59 = vadd.f32 %v1454_v14, %v978_v7 }
 0x24d   : > { %1696 = vst [vmem:[%s2588_s19 + $0x178] sm:$0xff] %v1552_v59 }
 0x24e PF: > { %s13_s12 = sadd.s32 1, %s1970_s12  }
 0x24f   : > { %p10_p4 = scmp.ge.s32.totalorder %s13_s12, 4  }
 0x251   :  { %12 = sbr.rel (!%p10_p4) target bundleno = 1 (0x1), region = 64 }

</bundles_post_ra>
